<compile_context>
chip_gen: v7x
topology: tpu7x:2x2x1
jax: 0.10.0
libtpu: 0.0.40
codegen_flags: <defaults>
</compile_context>

<pallas_src>
import jax
import jax.numpy as jnp
from jax.experimental import pallas as pl
from jax.experimental.pallas import tpu as pltpu


def _vq_kernel(z_ref, emb_ref, embt_ref, esq_ref, zq_ref, idx_ref):
    """One (batch, token-tile) block, tokens on the lane axis.

    z_ref   : (1, C, TN)  native dtype  encoder outputs (NCHW-native slab)
    emb_ref : (n_e, C)    f32           codebook (grid-invariant)
    embt_ref: (C, n_e)    f32           codebook transposed (grid-invariant)
    esq_ref : (n_e, 1)    f32           precomputed ||e_j||^2 (grid-invariant)
    zq_ref  : (1, C, TN)  out dtype     quantized vectors (NCHW-native slab)
    idx_ref : (1, 1, TN)  i32           argmin codebook indices (lane-dense)
    """
    z = z_ref[0].astype(jnp.float32)          # (C, TN) — in-vreg cast, no HBM pass
    emb = emb_ref[...]                        # (n_e, C)
    n_e = emb.shape[0]

    # d'^T = ||e||^2 - 2 (E @ z) : (n_e, TN).  The per-token ||z||^2 term is
    # argmin-invariant and d is never returned, so it is dropped.
    cross_t = jnp.dot(emb, z, preferred_element_type=jnp.float32)   # (n_e, TN)
    d_t = esq_ref[...] - 2.0 * cross_t                              # lane-bcast

    # first-min argmin over the n_e sublane rows (torch.argmin tie semantics)
    min_d = jnp.min(d_t, axis=0, keepdims=True)                     # (1, TN)
    row = jax.lax.broadcasted_iota(jnp.int32, d_t.shape, 0)         # (n_e, TN)
    idx = jnp.min(jnp.where(d_t == min_d, row, n_e),
                  axis=0, keepdims=True).astype(jnp.int32)          # (1, TN)

    # one-hot (transposed) via iota compare; z_q^T = E^T @ onehot^T : (C, TN)
    onehot_t = (row == idx).astype(jnp.float32)                     # (n_e, TN)
    zq_t = jnp.dot(embt_ref[...], onehot_t,
                   preferred_element_type=jnp.float32)              # (C, TN)

    zq_ref[0] = zq_t.astype(zq_ref.dtype)     # lane-dense, final dtype
    idx_ref[...] = idx[None]                  # (1, 1, TN) lane-dense


def _round_up(x, m):
    return -(-x // m) * m


def _vmem_tile_bytes(rows, cols, itemsize):
    """Bytes of a (rows, cols) VMEM tile incl. (8,128) padding & sublane packing."""
    sublane_mult = 8 * max(1, 4 // itemsize)          # 8 f32 / 16 bf16,f16 / 32 i8
    return _round_up(max(rows, 1), sublane_mult) * _round_up(max(cols, 1), 128) * itemsize


def _pick_hw_tile(hw, c, n_e, z_itemsize, out_itemsize,
                  requested=2048, vmem_budget_bytes=12 << 20):
    """Largest lane-tile (multiple of 128) whose working set fits the budget.

    12 MiB default keeps the kernel under v5e's 16 MiB default scoped-VMEM
    limit without needing vmem_limit_bytes; v6e/v7x (32 MiB scoped) have
    additional headroom.
    """
    hw128 = _round_up(hw, 128)
    tile = min(_round_up(requested, 128), hw128)

    def working_set(tn):
        streamed = 2 * (_vmem_tile_bytes(c, tn, z_itemsize)        # z in  (x2 buf)
                        + _vmem_tile_bytes(c, tn, out_itemsize)    # z_q out
                        + _vmem_tile_bytes(1, tn, 4))              # idx out
        invariant = 2 * (2 * _vmem_tile_bytes(n_e, c, 4)           # E, E^T
                         + _vmem_tile_bytes(n_e, 1, 4))            # ||e||^2
        temps = 4 * _vmem_tile_bytes(n_e, tn, 4)                   # cross/d/iota/onehot
        return streamed + invariant + temps

    while tile > 128 and working_set(tile) > vmem_budget_bytes:
        tile -= 128
    return tile


def vector_quantize_nchw(z, embedding, embedding_t=None, e_sq=None, *,
                         out_dtype=None, hw_tile_max=2048,
                         vmem_budget_bytes=12 << 20):
    """Runs the Pallas kernel on z:(B, C, H, W) with codebook embedding:(n_e, C).

    Returns (z_q:(B,C,H,W) out_dtype, idx:(B*H*W,) i32) — tokens in the same
    order as the reference's permute(0,2,3,1).view(-1, C).
    """
    B, C, H, W = z.shape
    n_e, C2 = embedding.shape
    assert C == C2
    if out_dtype is None:
        out_dtype = z.dtype

    embedding = embedding.astype(jnp.float32)
    if embedding_t is None:
        embedding_t = embedding.T
    embedding_t = embedding_t.astype(jnp.float32)
    if e_sq is None:
        e_sq = jnp.sum(embedding ** 2, axis=1, keepdims=True)
    e_sq = e_sq.reshape(n_e, 1).astype(jnp.float32)

    hw = H * W
    z_itemsize = jnp.dtype(z.dtype).itemsize
    out_itemsize = jnp.dtype(out_dtype).itemsize
    tile_max = _pick_hw_tile(hw, C, n_e, z_itemsize, out_itemsize,
                             hw_tile_max, vmem_budget_bytes)
    num_tiles = pl.cdiv(hw, tile_max)
    hw_tile = _round_up(pl.cdiv(hw, num_tiles), 128)   # redistribute to cut padding
    hw_pad = num_tiles * hw_tile

    # (B,C,H,W) -> (B,C,H*W) merges the two minor dims: free, no data movement.
    z3 = z.reshape(B, C, hw)
    if hw_pad != hw:
        # Padded token columns produce valid-but-unused outputs; sliced below.
        z3 = jnp.pad(z3, ((0, 0), (0, 0), (0, hw_pad - hw)))

    out_shapes = (
        jax.ShapeDtypeStruct((B, C, hw_pad), out_dtype),     # z_q (NCHW-native)
        jax.ShapeDtypeStruct((B, 1, hw_pad), jnp.int32),     # argmin idx
    )

    zq3, idx3 = pl.pallas_call(
        _vq_kernel,
        out_shape=out_shapes,
        grid_spec=pltpu.PrefetchScalarGridSpec(
            num_scalar_prefetch=0,
            grid=(B, num_tiles),
            in_specs=[
                pl.BlockSpec((1, C, hw_tile), lambda b, t: (b, 0, t)),   # z slab
                pl.BlockSpec((n_e, C), lambda b, t: (0, 0)),             # E
                pl.BlockSpec((C, n_e), lambda b, t: (0, 0)),             # E^T
                pl.BlockSpec((n_e, 1), lambda b, t: (0, 0)),             # ||e||^2
            ],
            out_specs=[
                pl.BlockSpec((1, C, hw_tile), lambda b, t: (b, 0, t)),
                pl.BlockSpec((1, 1, hw_tile), lambda b, t: (b, 0, t)),
            ],
        ),
        compiler_params=pltpu.CompilerParams(
            # both axes are embarrassingly parallel -> lets v7x shard across
            # its 2 TensorCores; a no-op on v5e/v6e.
            dimension_semantics=("parallel", "parallel"),
        ),
    )(z3, embedding, embedding_t, e_sq)

    if hw_pad != hw:
        zq3 = zq3[:, :, :hw]
        idx3 = idx3[:, :, :hw]
    z_q = zq3.reshape(B, C, H, W)
    idx_flat = idx3.reshape(-1)      # (B*H*W,), token order b*HW + h*W + w
    return z_q, idx_flat


class VectorQuantizerPallas:
    """JAX/Pallas port of the PyTorch VectorQuantizer forward pass."""

    def __init__(self, n_e, e_dim, beta, key):
        self.n_e = n_e
        self.e_dim = e_dim
        self.beta = beta
        self.eps = 1e-6
        # nn.Embedding(n_e, e_dim).weight ~ U(-1/n_e, 1/n_e), deterministic init.
        self.embedding = jax.random.uniform(
            key, (n_e, e_dim), dtype=jnp.float32,
            minval=-1.0 / n_e, maxval=1.0 / n_e)
        # codebook-only precomputes (tiny): E^T for the gather matmul, ||e_j||^2.
        self.embedding_t = self.embedding.T
        self.e_sq = jnp.sum(self.embedding ** 2, axis=1, keepdims=True)  # (n_e, 1)

    def __call__(self, z, mask=None):
        # z: (B, C, H, W) NCHW, same convention as the PyTorch module.
        B, C, H, W = z.shape
        assert C == self.e_dim
        # Reference: fp16 is upcast for compute and z_q is cast back to fp16;
        # here the upcast happens in-vreg inside the kernel, so the native
        # array is passed straight through (no extra HBM pass).
        out_dtype = z.dtype

        z_q, idx_flat = vector_quantize_nchw(
            z, self.embedding, self.embedding_t, self.e_sq, out_dtype=out_dtype)

        # min_encodings is rebuilt lazily from idx in plain JAX (the kernel no
        # longer writes the (N, n_e) f32 one-hot to HBM); XLA only materializes
        # it if a consumer actually uses it.
        min_encodings = jax.nn.one_hot(idx_flat, self.n_e, dtype=jnp.float32)
        min_encoding_indices = idx_flat[:, None]
        # TODO(synk): loss computation (incl. the mask branch) is dead code (a
        # commented-out string) in the reference forward, so it is not implemented.
        return z_q, (min_encodings, min_encoding_indices)


def _reference_jax(z, embedding):
    """Pure-JAX reference of the same math (full torch formula, for checking)."""
    B, C, H, W = z.shape
    zf = jnp.transpose(z, (0, 2, 3, 1)).reshape(-1, C)
    d = (jnp.sum(zf ** 2, axis=1, keepdims=True)
         + jnp.sum(embedding ** 2, axis=1)
         - 2.0 * zf @ embedding.T)
    idx = jnp.argmin(d, axis=1)
    zq = embedding[idx].reshape(B, H, W, C)
    return jnp.transpose(zq, (0, 3, 1, 2)), idx


if __name__ == "__main__":
    key = jax.random.PRNGKey(0)
    k_emb, k_z = jax.random.split(key)

    # Small shapes: batch=2, channels(e_dim)=4, spatial=16x16, codebook n_e=16.
    n_e, e_dim, beta = 16, 4, 0.25
    B, H, W = 2, 16, 16

    vq = VectorQuantizerPallas(n_e, e_dim, beta, k_emb)
    z = jax.random.normal(k_z, (B, e_dim, H, W), dtype=jnp.float32)

    z_q, (min_encodings, min_encoding_indices) = vq(z)
    jax.block_until_ready((z_q, min_encodings, min_encoding_indices))

    # sanity check vs pure-JAX reference (which uses the full distance formula)
    zq_ref, idx_ref = _reference_jax(z, vq.embedding)
    N = B * H * W
    assert z_q.shape == (B, e_dim, H, W)
    assert z_q.dtype == z.dtype
    assert min_encodings.shape == (N, n_e)
    assert min_encoding_indices.shape == (N, 1)
    assert jnp.array_equal(min_encoding_indices[:, 0], idx_ref)
    assert jnp.allclose(z_q, zq_ref, atol=1e-5)
    assert jnp.allclose(jnp.sum(min_encodings, axis=1), 1.0)

    print("KERNEL_OK")
</pallas_src>

<mosaic_0001>
module attributes {stable_mosaic.version = 11 : i64} {
  func.func @_vq_kernel(%arg0: i32, %arg1: i32, %arg2: memref<1x4x256xf32, #tpu.memory_space<vmem>>, %arg3: memref<16x4xf32, #tpu.memory_space<vmem>>, %arg4: memref<4x16xf32, #tpu.memory_space<vmem>>, %arg5: memref<16x1xf32, #tpu.memory_space<vmem>>, %arg6: memref<1x4x256xf32, #tpu.memory_space<vmem>>, %arg7: memref<1x1x256xi32, #tpu.memory_space<vmem>>) attributes {dimension_semantics = [#tpu.dimension_semantics<parallel>, #tpu.dimension_semantics<parallel>], iteration_bounds = array<i64: 2, 1>, scalar_prefetch = 0 : i64, scratch_operands = 0 : i64, tpu.core_type = #tpu.core_type<tc>, window_params = [{transform_indices = @transform_0, window_bounds = array<i64: 1, 4, 256>}, {pipeline_mode = #tpu.pipeline_mode<synchronous>, transform_indices = @transform_1, window_bounds = array<i64: 16, 4>}, {pipeline_mode = #tpu.pipeline_mode<synchronous>, transform_indices = @transform_2, window_bounds = array<i64: 4, 16>}, {pipeline_mode = #tpu.pipeline_mode<synchronous>, transform_indices = @transform_3, window_bounds = array<i64: 16, 1>}, {transform_indices = @transform_4, window_bounds = array<i64: 1, 4, 256>}, {transform_indices = @transform_5, window_bounds = array<i64: 1, 1, 256>}]} {
    %c0 = arith.constant 0 : index
    %c0_0 = arith.constant 0 : index
    %c0_1 = arith.constant 0 : index
    %0 = vector.load %arg2[%c0, %c0_0, %c0_1] : memref<1x4x256xf32, #tpu.memory_space<vmem>>, vector<1x4x256xf32>
    %1 = vector.shape_cast %0 : vector<1x4x256xf32> to vector<4x256xf32>
    %c0_2 = arith.constant 0 : index
    %c0_3 = arith.constant 0 : index
    %2 = vector.load %arg3[%c0_2, %c0_3] : memref<16x4xf32, #tpu.memory_space<vmem>>, vector<16x4xf32>
    %cst = arith.constant dense<0.000000e+00> : vector<16x256xf32>
    %3 = tpu.matmul %2, %1, %cst {dimension_numbers = #tpu.dot_dimension_numbers<[1], [0], [0], [1], [0, 0, 1, 1], [], []>} : vector<16x4xf32>, vector<4x256xf32>, vector<16x256xf32> -> vector<16x256xf32>
    %c0_4 = arith.constant 0 : index
    %c0_5 = arith.constant 0 : index
    %4 = vector.load %arg5[%c0_4, %c0_5] : memref<16x1xf32, #tpu.memory_space<vmem>>, vector<16x1xf32>
    %cst_6 = arith.constant 2.000000e+00 : f32
    %5 = vector.broadcast %cst_6 : f32 to vector<16x256xf32>
    %6 = arith.mulf %5, %3 : vector<16x256xf32>
    %7 = vector.broadcast %4 : vector<16x1xf32> to vector<16x256xf32>
    %8 = arith.subf %7, %6 : vector<16x256xf32>
    %cst_7 = arith.constant dense<0x7F800000> : vector<256xf32>
    %9 = vector.multi_reduction <minimumf>, %8, %cst_7 [0] : vector<16x256xf32> to vector<256xf32>
    %10 = vector.shape_cast %9 : vector<256xf32> to vector<1x256xf32>
    %11 = tpu.iota {dimensions = array<i32: 0>} : vector<16x256xi32>
    %12 = vector.broadcast %10 : vector<1x256xf32> to vector<16x256xf32>
    %13 = arith.cmpf oeq, %8, %12 : vector<16x256xf32>
    %c16_i32 = arith.constant 16 : i32
    %14 = vector.broadcast %c16_i32 : i32 to vector<16x256xi32>
    %15 = arith.select %13, %11, %14 : vector<16x256xi1>, vector<16x256xi32>
    %cst_8 = arith.constant dense<2147483647> : vector<256xi32>
    %16 = vector.multi_reduction <minsi>, %15, %cst_8 [0] : vector<16x256xi32> to vector<256xi32>
    %17 = vector.shape_cast %16 : vector<256xi32> to vector<1x256xi32>
    %18 = vector.broadcast %17 : vector<1x256xi32> to vector<16x256xi32>
    %19 = arith.cmpi eq, %11, %18 : vector<16x256xi32>
    %20 = arith.extui %19 : vector<16x256xi1> to vector<16x256xi32>
    %21 = arith.sitofp %20 : vector<16x256xi32> to vector<16x256xf32>
    %c0_9 = arith.constant 0 : index
    %c0_10 = arith.constant 0 : index
    %22 = vector.load %arg4[%c0_9, %c0_10] : memref<4x16xf32, #tpu.memory_space<vmem>>, vector<4x16xf32>
    %cst_11 = arith.constant dense<0.000000e+00> : vector<4x256xf32>
    %23 = tpu.matmul %22, %21, %cst_11 {dimension_numbers = #tpu.dot_dimension_numbers<[1], [0], [0], [1], [0, 0, 1, 1], [], []>} : vector<4x16xf32>, vector<16x256xf32>, vector<4x256xf32> -> vector<4x256xf32>
    %c0_12 = arith.constant 0 : index
    %c0_13 = arith.constant 0 : index
    %c0_14 = arith.constant 0 : index
    %24 = vector.load %arg6[%c0_12, %c0_13, %c0_14] : memref<1x4x256xf32, #tpu.memory_space<vmem>>, vector<1x4x256xf32>
    %25 = vector.shape_cast %24 : vector<1x4x256xf32> to vector<4x256xf32>
    %26 = vector.shape_cast %23 : vector<4x256xf32> to vector<1x4x256xf32>
    tpu.vector_store %arg6[%c0_12, %c0_13, %c0_14], %26 {strides = array<i32>} : memref<1x4x256xf32, #tpu.memory_space<vmem>>, vector<1x4x256xf32>,
    %27 = vector.shape_cast %17 : vector<1x256xi32> to vector<1x1x256xi32>
    %c0_15 = arith.constant 0 : index
    %c0_16 = arith.constant 0 : index
    %c0_17 = arith.constant 0 : index
    %28 = vector.load %arg7[%c0_15, %c0_16, %c0_17] : memref<1x1x256xi32, #tpu.memory_space<vmem>>, vector<1x1x256xi32>
    tpu.vector_store %arg7[%c0_15, %c0_16, %c0_17], %27 {strides = array<i32>} : memref<1x1x256xi32, #tpu.memory_space<vmem>>, vector<1x1x256xi32>,
    return
  }
  func.func @transform_0(%arg0: i32, %arg1: i32) -> (i32, i32, i32) {
    %c0_i32 = arith.constant 0 : i32
    %c0_i32_0 = arith.constant 0 : i32
    return %arg0, %c0_i32, %arg1 : i32, i32, i32
  }
  func.func @transform_1(%arg0: i32, %arg1: i32) -> (i32, i32) {
    %c0_i32 = arith.constant 0 : i32
    %c0_i32_0 = arith.constant 0 : i32
    %c0_i32_1 = arith.constant 0 : i32
    return %c0_i32, %c0_i32_0 : i32, i32
  }
  func.func @transform_2(%arg0: i32, %arg1: i32) -> (i32, i32) {
    %c0_i32 = arith.constant 0 : i32
    %c0_i32_0 = arith.constant 0 : i32
    %c0_i32_1 = arith.constant 0 : i32
    return %c0_i32, %c0_i32_0 : i32, i32
  }
  func.func @transform_3(%arg0: i32, %arg1: i32) -> (i32, i32) {
    %c0_i32 = arith.constant 0 : i32
    %c0_i32_0 = arith.constant 0 : i32
    %c0_i32_1 = arith.constant 0 : i32
    return %c0_i32, %c0_i32_0 : i32, i32
  }
  func.func @transform_4(%arg0: i32, %arg1: i32) -> (i32, i32, i32) {
    %c0_i32 = arith.constant 0 : i32
    %c0_i32_0 = arith.constant 0 : i32
    return %arg0, %c0_i32, %arg1 : i32, i32, i32
  }
  func.func @transform_5(%arg0: i32, %arg1: i32) -> (i32, i32, i32) {
    %c0_i32 = arith.constant 0 : i32
    %c0_i32_0 = arith.constant 0 : i32
    return %arg0, %c0_i32, %arg1 : i32, i32, i32
  }
}

</mosaic_0001>

<bundles_post_ra>
// kernel: tpu_custom_call.1
= control target key start
LH: loop header
LB: loop body
LE: loop exit
PB: predicated region body
PF: predicated region fallthrough
CT: control target
= control target key end

     0   :  { %11 = vsyncpa [#allocation3], 0  ;;  %s1098_s0 = inlined_call_operand.vmem [shape: f32[2,4,256], index: 0, kind: input, shape index: {}]   ;;  %s1099_s1 = inlined_call_operand.vmem [shape: f32[16,4], index: 1, kind: input, shape index: {}]   ;;  %s1100_s2 = inlined_call_operand.vmem [shape: f32[4,16], index: 2, kind: input, shape index: {}]   ;;  %s1101_s3 = inlined_call_operand.vmem [shape: f32[16,1], index: 3, kind: input, shape index: {}]   ;;  %s1102_s4 = inlined_call_operand.hbm [shape: f32[2,4,256], index: 4, kind: output, shape index: {0}]   ;;  %s1103_s5 = inlined_call_operand.hbm [shape: s32[2,1,256], index: 5, kind: output, shape index: {1}]  }
   0x1   :  { %13 = vsyncpa [#allocation3 + $0x1], 0 }
   0x2   :  { %14 = vsyncpa [#allocation5], 0 }
   0x3   :  { %16 = vsyncpa [#allocation5 + $0x1], 0  ;;  %s942_s18 = smov 0   ;;  %s944_s19 = smov 0  }
   0x4   :  { %s946_s20 = smov 0   ;;  %s948_s21 = smov 0  }
   0x5   :  { %s950_s22 = smov 0   ;;  %s952_s23 = smov 0  }
   0x6 LB: > { %s691_s24 = sadd.s32 4294967295, %s904_s23   ;;  %s692_s25 = sadd.s32 4294967294, %s904_s23   ;;  %s904_s23 = sphi %s952_s23, %s22_s23   ;;  %s900_s22 = sphi %s950_s22, %s1110_s22   ;;  %s896_s21 = sphi %s948_s21, %s1109_s21   ;;  %s892_s20 = sphi %s946_s20, %s1108_s20   ;;  %s888_s19 = sphi %s944_s19, %s1107_s19   ;;  %s884_s18 = sphi %s942_s18, %s1106_s18  }
   0x7   : > { %s34_s26 = sadd.s32 1, %s900_s22  ;;  %s134_s27 = sadd.s32 1, %s892_s20 }
   0x8   : > { %p36_p0 = scmp.ge.s32.totalorder %s34_s26, 2  ;;  %p144_p1 = scmp.ne.s32.totalorder %s892_s20, %s888_s19 }
   0x9   : > { %p145_p2 = scmp.eq.s32.totalorder %s691_s24, 1  ;;  %p150_p3 = scmp.ne.s32.totalorder %s888_s19, %s884_s18 }
   0xa   : > { %s1112_s26 = smov (%p36_p0, %s34_s26), 0  ;;  %p151_p5 = scmp.eq.s32.totalorder %s692_s25, 1 }
   0xb   : > { %p982_p4 = por %p145_p2, %p144_p1  ;;  %s129_s29 = ssub.s32 %s900_s22, %s1112_s26 }
   0xc   : > { %p695_p6 = scmp.ge.s32.totalorder %s904_s23, 1  ;;  %p132_p7 = scmp.eq.s32.totalorder %s129_s29, 0 }
   0xd   : > { %p989_p8 = por %p151_p5, %p150_p3  ;;  %p219_p9 = scmp.lt.s32.totalorder %s904_s23, 3 }
   0xe   : > { %s995_s6 = scalar_select %p132_p7, %s892_s20, %s134_s27  }
   0xf   : > { %p220_p10 = pnand %p695_p6, %p219_p9 }
  0x10   : > { %p257_p11 = scmp.lt.s32.totalorder (!%p220_p10), %s896_s21, 1  ;;  %v906_v0 = vmov (!%p220_p10), 0.0   ;;  %v362_v1 = vld [vmem:[%s1101_s3] sm:$0xff] (!%p220_p10)  ;;  %v907_v2 = vmov (!%p220_p10), 0   ;;  %v363_v3 = vld [vmem:[%s1101_s3 + $0x8] sm:$0xff] (!%p220_p10)  ;;  %vm280_vm0 = vcmask (!%p220_p10), 1043456   ;;  %v396_v25 = vlaneseq (!%p220_p10) }
  0x11   : > { %223 = sbr.rel (%p220_p10) target bundleno = 519 (0x207), region = 36  ;;  %349 = vmatprep.mubr.f32.mxu0 (!%p220_p10), %v906_v0  ;;  %510 = vmatprep.mubr.f32.mxu1 (!%p220_p10), %v906_v0  ;;  %v269_v6 = vld [vmem:[%s1099_s1] sm:$0xff] (!%p220_p10)  ;;  %vm273_vm1 = vcmask (!%p220_p10), 31744   ;;  %v270_v7 = vld [vmem:[%s1099_s1 + $0x8] sm:$0xff] (!%p220_p10)  ;;  %v908_v48 = vmov (!%p220_p10), 1966171168  }
  0x12   : > { %792 = vset.pattern.permute.xlu0 (!%p220_p10), %v907_v2  ;;  %v397_v30 = vshrl.u32 (!%p220_p10), %v396_v25, 7  ;;  %v524_v49 = vunpack.c.l.s4 (!%p220_p10), %v908_v48  ;;  %s1015_s27 = sand.u32 (!%p220_p10), 1, %s888_s19   ;;  %v909_v62 = vmov (!%p220_p10), 1.0|1.0   ;;  %s910_s17 = smov (!%p220_p10), [#allocation4]  }
  0x13   : > { %370 = vperm.xlu0 (!%p220_p10), %792, %v362_v1   ;;  %s697_s29 = sshll.u32 (!%p220_p10), %s1015_s27, 1  ;;  %s798_s24 = sshll.u32 (!%p220_p10), %s910_s17, 4  ;;  %s799_s24 = int_to_ptr.vmem [resolvable:$false] %s798_s24 }
  0x14   : > { %v398_v35 = vadd.s32 (!%p220_p10), 8, %v397_v30  ;;  %v525_v54 = vunpack.c.0.s8 (!%p220_p10), %v524_v49  ;;  %s800_s25 = scalar_lea.vmem (!%p220_p10), %s799_s24, 64 }
  0x16   : > { %v528_v59 = vsub.s32 (!%p220_p10), %v525_v54, %v397_v30 }
  0x17   : > { %375 = vperm.xlu0 (!%p220_p10), %792, %v363_v3  }
  0x18   : > { %s258_s9 = scalar_select %p257_p11, %s896_s21, 1 }
  0x1a   : > { %s721_s10 = sshll.u32 %s258_s9, 3  ;;  %s255_s9 = scalar_lea.vmem [#allocation4], %s697_s29 }
  0x1b   : > { %s264_s15 = scalar_lea.vmem %s1098_s0, %s721_s10  ;;  %s723_s10 = sshll.u32 %s896_s21, 5 }
  0x1c   : > { %v268_v4 = vld [vmem:[%s264_s15] sm:$0xff]  ;;  %s580_s11 = sshll.u32 %s255_s9, 4  ;;  %s1025_s14 = scalar_lea.hbm %s1103_s5, %s723_s10  ;;  %s581_s11 = int_to_ptr.vmem [resolvable:$true] %s580_s11 }
  0x1d   : > { %v272_v5 = vcombine.high %v268_v4, %v268_v4  ;;  %s548_s15 = scalar_lea.sflag [#allocation5], %s1015_s27  ;;  %s794_s16 = scalar_lea.vmem %s581_s11, 32 }
  0x1e   : > { %p795_p12 = scmp.ne.s32.totalorder %s581_s11, %s794_s16  ;;  %p801_p1 = scmp.lt.s32.totalorder %s581_s11, %s799_s24 }
  0x1f   : > { %700 = vmatprep.subr.msk.mxu0 %vm280_vm0, %v272_v5  ;;  %p802_p2 = scmp.lt.s32.totalorder %s800_s25, %s794_s16 }
  0x20   : > { %701 = vmatpush1.msk.msra.mxu0 %vm280_vm0, %v268_v4  ;;  %p796_p13 = pnand %p795_p12, %p982_p4 }
  0x21   : > { %702 = vmatmul.mubr.msk.f32.vlgmr.msra.gmra.mrb[0].mxu0 %vm273_vm1, %v269_v6  ;;  %p803_p3 = por %p802_p2, %p801_p1 }
  0x22   : > { %355 = vmatprep.mubr.f32.mxu0 %v906_v0  ;;  %v441_v0 = vld [vmem:[%s1100_s2] sm:$0xf]  ;;  %p797_p0 = pneg %p796_p13 }
  0x24   : > { %p804_p5 = pnand %p803_p3, %p797_p0 }
  0x25   : > { %703 = vmatmul.mubr.msk.f32.gmra.mrb[2].mxu0 %vm273_vm1, %v270_v7 }
  0x92   : > { %v371_v8 = vpop.permute.xlu0 %370 }
  0x96   : > { %v376_v16 = vpop.permute.xlu0 %375 }
  0xf4   : > { %v351_v9 = vpop.f32.mrb[0].mxu0 }
  0xf5   : > { %v353_v10 = vpop.f32.mrb[1].mxu0  ;;  %v364_v11 = vmul.f32 2.0, %v351_v9 }
  0xf6   : > { %v365_v12 = vmul.f32 2.0, %v353_v10 }
  0xf7   : > { %v378_v18 = vsub.f32 %v371_v8, %v364_v11 }
  0xf8   : > { %v357_v13 = vpop.f32.mrb[2].mxu0  ;;  %v379_v20 = vsub.f32 %v371_v8, %v365_v12 }
  0xf9   : > { %v366_v14 = vmul.f32 2.0, %v357_v13  ;;  %v359_v15 = vpop.f32.mrb[3].mxu0 }
  0xfa   : > { %v367_v17 = vmul.f32 2.0, %v359_v15 }
  0xfb   : > { %v380_v19 = vsub.f32 %v376_v16, %v366_v14 }
  0xfc   : > { %v381_v21 = vsub.f32 %v376_v16, %v367_v17 }
  0xfd   : > { %v382_v22 = vmin.f32 %v378_v18, %v380_v19 }
  0xfe   : > { %v389_v23 = vmin.f32 %v379_v20, %v381_v21 }
  0xff   : > { %v383_v24 = vrot.slane %v382_v22, 4 }
 0x100   : > { %v390_v26 = vrot.slane %v389_v23, 4 }
 0x101   : > { %v384_v27 = vmin.f32 %v382_v22, %v383_v24 }
 0x102   : > { %v391_v28 = vmin.f32 %v389_v23, %v390_v26 }
 0x103   : > { %v385_v29 = vrot.slane %v384_v27, 2 }
 0x104   : > { %v392_v31 = vrot.slane %v391_v28, 2 }
 0x105   : > { %v386_v32 = vmin.f32 %v384_v27, %v385_v29 }
 0x106   : > { %v393_v33 = vmin.f32 %v391_v28, %v392_v31 }
 0x107   : > { %v387_v34 = vrot.slane %v386_v32, 1 }
 0x108   : > { %v394_v36 = vrot.slane %v393_v33, 1 }
 0x109   : > { %v388_v37 = vmin.f32 %v386_v32, %v387_v34 }
 0x10a   : > { %v395_v38 = vmin.f32 %v393_v33, %v394_v36 }
 0x10b   : > { %vm399_vm2 = vcmp.eq.f32.partialorder %v378_v18, %v388_v37  ;;  %vm401_vm3 = vcmp.eq.f32.partialorder %v380_v19, %v388_v37 }
 0x10c   : > { %v403_v39 = vsel %vm399_vm2, %v397_v30, 16  ;;  %v405_v40 = vsel %vm401_vm3, %v398_v35, 16  ;;  %vm400_vm4 = vcmp.eq.f32.partialorder %v379_v20, %v395_v38  ;;  %vm402_vm5 = vcmp.eq.f32.partialorder %v381_v21, %v395_v38 }
 0x10d   : > { %vm407_vm6 = vcmp.lt.s32.totalorder %v403_v39, %v405_v40  ;;  %v404_v41 = vsel %vm400_vm4, %v397_v30, 16  ;;  %v406_v42 = vsel %vm402_vm5, %v398_v35, 16  ;;  %vm442_vm4 = vcmask 130048  }
 0x10e   : > { %v408_v43 = vsel %vm407_vm6, %v403_v39, %v405_v40  ;;  %vm418_vm7 = vcmp.lt.s32.totalorder %v404_v41, %v406_v42  ;;  %vm539_vm5 = vcmp.lt.s32.totalorder %v396_v25, 256 }
 0x10f   : > { %v409_v44 = vrot.slane %v408_v43, 4  ;;  %v419_v45 = vsel %vm418_vm7, %v404_v41, %v406_v42 }
 0x110   : > { %v420_v46 = vrot.slane %v419_v45, 4 }
 0x111   : > { %vm410_vm8 = vcmp.lt.s32.totalorder %v408_v43, %v409_v44 }
 0x112   : > { %vm421_vm9 = vcmp.lt.s32.totalorder %v419_v45, %v420_v46  ;;  %v411_v47 = vsel %vm410_vm8, %v408_v43, %v409_v44 }
 0x113   : > { %v422_v50 = vsel %vm421_vm9, %v419_v45, %v420_v46  ;;  %v412_v51 = vrot.slane %v411_v47, 2 }
 0x114   : > { %v423_v52 = vrot.slane %v422_v50, 2 }
 0x115   : > { %vm413_vm10 = vcmp.lt.s32.totalorder %v411_v47, %v412_v51 }
 0x116   : > { %vm424_vm11 = vcmp.lt.s32.totalorder %v422_v50, %v423_v52  ;;  %v414_v53 = vsel %vm413_vm10, %v411_v47, %v412_v51 }
 0x117   : > { %v425_v55 = vsel %vm424_vm11, %v422_v50, %v423_v52  ;;  %v415_v56 = vrot.slane %v414_v53, 1 }
 0x118   : > { %v426_v57 = vrot.slane %v425_v55, 1 }
 0x119   : > { %vm416_vm12 = vcmp.lt.s32.totalorder %v414_v53, %v415_v56 }
 0x11a   : > { %vm427_vm13 = vcmp.lt.s32.totalorder %v425_v55, %v426_v57  ;;  %v417_v58 = vsel %vm416_vm12, %v414_v53, %v415_v56 }
 0x11b   : > { %v428_v60 = vsel %vm427_vm13, %v425_v55, %v426_v57  ;;  %vm429_vm14 = vcmp.eq.s32.totalorder %v397_v30, %v417_v58  ;;  %vm431_vm15 = vcmp.eq.s32.totalorder %v398_v35, %v417_v58 }
 0x11c   : > { %vm430_vm0 = vcmp.eq.s32.totalorder %v397_v30, %v428_v60  ;;  %vm432_vm1 = vcmp.eq.s32.totalorder %v398_v35, %v428_v60  ;;  %v522_v61 = vcombine.low %v417_v58, %v428_v60  ;;  %vm726_vm3 = vmpackc.low %vm431_vm15, %vm429_vm14 }
 0x11d   : > { %vm724_vm2 = vmpackc.low %vm432_vm1, %vm430_vm0 }
 0x11e   : > { %725 = vmatprep.subr.msk.bf16.mxu1 %vm724_vm2, %v909_v62  ;;  %v529_v63 = vrot.slane %v522_v61, %v528_v59 }
 0x11f   : > { %727 = vmatpush1.bf16.msk.msra.mxu1 %vm726_vm3, %v909_v62 }
 0x120   : > { %v536_v1 = vrot.slane %v529_v63, %v528_v59 }
 0x122   : > { %712 = vmatmul.mubr.msk.f32.vlgmr.msra.gmra.mrb[0].mxu1 %vm442_vm4, %v441_v0  ;;  %541 = vst.msk [vmem:[%s255_s9] sm:$0x3] %vm539_vm5, %v536_v1 }
 0x123   : > { %807 = shalt.err (!%p804_p5)
}
 0x124   : > { %s808_s29 = scalar_lea.hbm %s1025_s14, 32  ;;  %s812_s9 = scalar_lea.hbm %s1103_s5, 64 }
 0x125   : > { %p809_p6 = scmp.ne.s32.totalorder %s1025_s14, %s808_s29  ;;  %p813_p10 = scmp.lt.u32.totalorder %s1025_s14, %s1103_s5 }
 0x126   : > { %p814_p11 = scmp.lt.u32.totalorder %s812_s9, %s808_s29  ;;  %p816_p13 = scmp.lt.u32.totalorder %s808_s29, %s1025_s14 }
 0x127   : > { %p810_p7 = pnand %p809_p6, %p982_p4 }
 0x128   : > { %p815_p12 = por %p814_p11, %p813_p10 }
 0x129   : > { %p811_p9 = pneg %p810_p7 }
 0x12a   : > { %p817_p0 = por %p816_p13, %p815_p12 }
 0x12c   : > { %p818_p1 = pnand %p817_p0, %p811_p9 }
 0x12e   : > { %821 = shalt.err (!%p818_p1)
}
 0x12f   : > { %729 = dma.vmem_to_hbm [thread:$0]  (%p982_p4), %s581_s11, 32, %s1025_s14, %s548_s15  }
 0x130   : > { %s696_s13 = sshll.u32 %s1015_s27, 3  ;;  %s722_s16 = sshll.u32 %s896_s21, 7 }
 0x131   : > { %s248_s17 = scalar_lea.vmem [#allocation2], %s696_s13  ;;  %s1050_s7 = scalar_lea.hbm %s1102_s4, %s722_s16 }
 0x132   : > { %s564_s24 = sshll.u32 %s248_s17, 4  ;;  %s543_s8 = scalar_lea.sflag [#allocation3], %s1015_s27  ;;  %s1052_s24 = int_to_ptr.vmem [resolvable:$true] %s564_s24 }
 0x133   : > { %s822_s11 = scalar_lea.vmem %s1052_s24, 128  ;;  %s911_s21 = smov [#allocation2]  }
 0x134   : > { %p823_p2 = scmp.ne.s32.totalorder %s1052_s24, %s822_s11  ;;  %s826_s14 = sshll.u32 %s911_s21, 4  ;;  %s827_s14 = int_to_ptr.vmem [resolvable:$false] %s826_s14 }
 0x135   : > { %s828_s15 = scalar_lea.vmem %s827_s14, 256  ;;  %p829_p6 = scmp.lt.s32.totalorder %s1052_s24, %s827_s14 }
 0x136   : > { %p824_p3 = pnand %p823_p2, %p982_p4  ;;  %p830_p7 = scmp.lt.s32.totalorder %s828_s15, %s822_s11 }
 0x138   : > { %p825_p5 = pneg %p824_p3  ;;  %p831_p9 = por %p830_p7, %p829_p6 }
 0x13a   : > { %p832_p10 = pnand %p831_p9, %p825_p5 }
 0x1f5   : > { %v512_v2 = vpop.f32.mrb[0].mxu1 }
 0x1f6   : > { %v514_v3 = vpop.f32.mrb[1].mxu1 }
 0x1f7   : > { %v519_v4 = vcombine.low %v512_v2, %v514_v3 }
 0x1f9   : > { %521 = vst [vmem:[%s248_s17] sm:$0xff] %v519_v4 }
 0x1fa   : > { %835 = shalt.err (!%p832_p10)
}
 0x1fb   : > { %s836_s27 = scalar_lea.hbm %s1050_s7, 128  ;;  %s840_s12 = scalar_lea.hbm %s1102_s4, 256 }
 0x1fc   : > { %p837_p11 = scmp.ne.s32.totalorder %s1050_s7, %s836_s27  ;;  %p841_p0 = scmp.lt.u32.totalorder %s1050_s7, %s1102_s4 }
 0x1fd   : > { %p842_p1 = scmp.lt.u32.totalorder %s840_s12, %s836_s27  ;;  %p844_p3 = scmp.lt.u32.totalorder %s836_s27, %s1050_s7 }
 0x1fe   : > { %p838_p12 = pnand %p837_p11, %p982_p4 }
 0x1ff   : > { %p843_p2 = por %p842_p1, %p841_p0 }
 0x200   : > { %p839_p13 = pneg %p838_p12 }
 0x201   : > { %p845_p5 = por %p844_p3, %p843_p2 }
 0x203   : > { %p846_p6 = pnand %p845_p5, %p839_p13 }
 0x205   : > { %849 = shalt.err (!%p846_p6)
}
 0x206   : > { %728 = dma.vmem_to_hbm [thread:$0]  (%p982_p4), %s1052_s24, 128, %s1050_s7, %s543_s8  }
 0x207 PF: > { %p739_p7 = scmp.ge.s32.totalorder %s904_s23, 2  ;;  %s592_s17 = sand.u32 1, %s884_s18  }
 0x208   : > { %s593_s25 = scalar_lea.sflag [#allocation3], %s592_s17 }
 0x209   : > { %p733_p9 = pnand %p739_p7, %p989_p8 }
 0x20b   : > { %875 = dma.done.wait (!%p733_p9), %s593_s25, 128  }
 0x20c   : > { %877 = vsyncadd (!%p733_p9), %s593_s25, 4294967168  ;;  %s602_s29 = scalar_lea.sflag [#allocation5], %s592_s17 }
 0x20d   : > { %879 = dma.done.wait (!%p733_p9), %s602_s29, 32  }
 0x20e   : > { %881 = vsyncadd (!%p733_p9), %s602_s29, 4294967264  ;;  %s22_s23 = sadd.s32 1, %s904_s23   ;;  %s1106_s18 = smov %s888_s19 }
 0x20f   : > { %p19_p10 = scmp.ge.s32.totalorder %s22_s23, 4   ;;  %s1107_s19 = smov %s892_s20 }
 0x210   : > { %s1108_s20 = smov %s995_s6  ;;  %s1109_s21 = smov %s900_s22 }
 0x211   : > { %s1110_s22 = smov %s1112_s26  ;;  %21 = sbr.rel (!%p19_p10) target bundleno = 6 (0x6), region = 88 }
 0x218   :  { %607 = vsyncpa [#allocation3], 1 }
 0x219   :  { %609 = vsyncpa [#allocation3 + $0x1], 1 }
 0x21a   :  { %610 = vsyncpa [#allocation5], 1 }
 0x21b   :  { %612 = vsyncpa [#allocation5 + $0x1], 1 }

</bundles_post_ra>
